<compile_context>
chip_gen: v6e
topology: v6e:2x2x1
jax: 0.10.0
libtpu: 0.0.40
codegen_flags: <defaults>
</compile_context>

<pallas_src>
import jax
import jax.numpy as jnp
from jax.experimental import pallas as pl
from jax.experimental.pallas import tpu as pltpu


def _make_fused_kernel(transpose_v2: bool):
    """Builds the fused kernel. `transpose_v2` is a static flag (True iff H > 1)."""

    def kernel(x1_ref, x2_ref, w_ref, b_ref, o1_ref, o2_ref, o3_ref):
        # x1_ref: (BC, H, 2) VMEM     x2_ref: (M2, 2) VMEM
        # w_ref : (2, 2) SMEM  (PyTorch nn.Linear layout: (out, in))
        # b_ref : (2,)   SMEM
        # o1_ref: (BC, H, 2)   o2_ref: (BC, 2, H)   o3_ref: (M2, 2)
        w00 = w_ref[0, 0]
        w01 = w_ref[0, 1]
        w10 = w_ref[1, 0]
        w11 = w_ref[1, 1]
        b0 = b_ref[0]
        b1 = b_ref[1]

        # ---- v1 (and v2) from x1:  y[..., n] = x[...,0]*w[n,0] + x[...,1]*w[n,1] + b[n]
        a0 = x1_ref[:, :, 0:1]                      # (BC, H, 1)
        a1 = x1_ref[:, :, 1:2]                      # (BC, H, 1)
        y1c0 = a0 * w00 + a1 * w01 + b0             # column 0 of v1
        y1c1 = a0 * w10 + a1 * w11 + b1             # column 1 of v1
        o1_ref[:, :, 0:1] = y1c0
        o1_ref[:, :, 1:2] = y1c1

        # v2 = v1.permute(0,1,3,2): rows of v2 are the columns of v1.
        if transpose_v2:
            # General H > 1: tiny XLU relayout inside the same launch.
            o2_ref[:, 0:1, :] = jnp.swapaxes(y1c0, 1, 2)   # (BC, 1, H)
            o2_ref[:, 1:2, :] = jnp.swapaxes(y1c1, 1, 2)
        else:
            # H == 1: (BC, 1, 1) already matches — pure relabel, no transpose op.
            o2_ref[:, 0:1, :] = y1c0
            o2_ref[:, 1:2, :] = y1c1

        # ---- v3 from x2
        c0 = x2_ref[:, 0:1]                         # (M2, 1)
        c1 = x2_ref[:, 1:2]
        o3_ref[:, 0:1] = c0 * w00 + c1 * w01 + b0
        o3_ref[:, 1:2] = c0 * w10 + c1 * w11 + b1

    return kernel


def model_forward(x1, x2, weight, bias):
    """Replicates Model.forward: returns (v1, v2, v3)."""
    B1, C1, H1, W1 = x1.shape
    B2, C2, H2, W2 = x2.shape
    N, K = weight.shape
    assert N == 2 and K == 2 and W1 == 2 and W2 == 2, "module is Linear(2, 2)"

    BC1 = B1 * C1
    M2 = B2 * C2 * H2

    # Leading-dim merges only: layout-preserving bitcasts (no data movement).
    x1_3d = x1.reshape(BC1, H1, W1)
    x2_2d = x2.reshape(M2, W2)

    kernel = _make_fused_kernel(transpose_v2=(H1 != 1))

    o1, o2, o3 = pl.pallas_call(
        kernel,
        out_shape=(
            jax.ShapeDtypeStruct((BC1, H1, N), jnp.float32),   # v1 (flattened)
            jax.ShapeDtypeStruct((BC1, N, H1), jnp.float32),   # v2 (flattened)
            jax.ShapeDtypeStruct((M2, N), jnp.float32),        # v3 (flattened)
        ),
        in_specs=[
            pl.BlockSpec(memory_space=pltpu.MemorySpace.VMEM),  # x1
            pl.BlockSpec(memory_space=pltpu.MemorySpace.VMEM),  # x2
            pl.BlockSpec(memory_space=pltpu.MemorySpace.SMEM),  # weight (scalars)
            pl.BlockSpec(memory_space=pltpu.MemorySpace.SMEM),  # bias   (scalars)
        ],
        out_specs=(
            pl.BlockSpec(memory_space=pltpu.MemorySpace.VMEM),
            pl.BlockSpec(memory_space=pltpu.MemorySpace.VMEM),
            pl.BlockSpec(memory_space=pltpu.MemorySpace.VMEM),
        ),
    )(x1_3d, x2_2d, weight, bias)

    # Leading-dim splits only: bitcasts.
    v1 = o1.reshape(B1, C1, H1, N)
    v2 = o2.reshape(B1, C1, N, H1)
    v3 = o3.reshape(B2, C2, H2, N)
    return v1, v2, v3


if __name__ == "__main__":
    key = jax.random.PRNGKey(0)
    k1, k2, kw, kb = jax.random.split(key, 4)

    # Shapes from the PyTorch script: x1, x2 = (1, 2, 1, 2)
    x1 = jax.random.normal(k1, (1, 2, 1, 2), dtype=jnp.float32)
    x2 = jax.random.normal(k2, (1, 2, 1, 2), dtype=jnp.float32)

    # Deterministic Linear(2, 2) parameters (PyTorch layout: weight (out, in)).
    weight = jax.random.normal(kw, (2, 2), dtype=jnp.float32) * 0.5
    bias = jax.random.normal(kb, (2,), dtype=jnp.float32) * 0.5

    fwd = jax.jit(model_forward)
    v1, v2, v3 = fwd(x1, x2, weight, bias)
    jax.block_until_ready((v1, v2, v3))

    # Sanity check against plain-JAX reference.
    ref1 = jnp.einsum("bchw,nw->bchn", x1, weight) + bias
    ref2 = jnp.transpose(ref1, (0, 1, 3, 2))
    ref3 = jnp.einsum("bchw,nw->bchn", x2, weight) + bias
    assert v1.shape == (1, 2, 1, 2)
    assert v2.shape == (1, 2, 2, 1)
    assert v3.shape == (1, 2, 1, 2)
    assert jnp.allclose(v1, ref1, atol=1e-5)
    assert jnp.allclose(v2, ref2, atol=1e-5)
    assert jnp.allclose(v3, ref3, atol=1e-5)

    print("KERNEL_OK")
</pallas_src>

<mosaic_0001>
module attributes {stable_mosaic.version = 11 : i64} {
  func.func @kernel(%arg0: memref<2x1x2xf32, #tpu.memory_space<vmem>>, %arg1: memref<2x2xf32, #tpu.memory_space<vmem>>, %arg2: memref<2x2xf32, #tpu.memory_space<smem>>, %arg3: memref<2xf32, #tpu.memory_space<smem>>, %arg4: memref<2x1x2xf32, #tpu.memory_space<vmem>>, %arg5: memref<2x2x1xf32, #tpu.memory_space<vmem>>, %arg6: memref<2x2xf32, #tpu.memory_space<vmem>>) attributes {dimension_semantics = [], scalar_prefetch = 0 : i64, scratch_operands = 0 : i64, tpu.core_type = #tpu.core_type<tc>} {
    %c0 = arith.constant 0 : index
    %c0_0 = arith.constant 0 : index
    %0 = memref.load %arg2[%c0, %c0_0] : memref<2x2xf32, #tpu.memory_space<smem>>
    %c0_1 = arith.constant 0 : index
    %c1 = arith.constant 1 : index
    %1 = memref.load %arg2[%c0_1, %c1] : memref<2x2xf32, #tpu.memory_space<smem>>
    %c1_2 = arith.constant 1 : index
    %c0_3 = arith.constant 0 : index
    %2 = memref.load %arg2[%c1_2, %c0_3] : memref<2x2xf32, #tpu.memory_space<smem>>
    %c1_4 = arith.constant 1 : index
    %c1_5 = arith.constant 1 : index
    %3 = memref.load %arg2[%c1_4, %c1_5] : memref<2x2xf32, #tpu.memory_space<smem>>
    %c0_6 = arith.constant 0 : index
    %4 = memref.load %arg3[%c0_6] : memref<2xf32, #tpu.memory_space<smem>>
    %c1_7 = arith.constant 1 : index
    %5 = memref.load %arg3[%c1_7] : memref<2xf32, #tpu.memory_space<smem>>
    %c0_8 = arith.constant 0 : index
    %c0_9 = arith.constant 0 : index
    %c0_10 = arith.constant 0 : index
    %6 = vector.load %arg0[%c0_8, %c0_9, %c0_10] : memref<2x1x2xf32, #tpu.memory_space<vmem>>, vector<2x1x1xf32>
    %c0_11 = arith.constant 0 : index
    %c0_12 = arith.constant 0 : index
    %c1_13 = arith.constant 1 : index
    %7 = vector.load %arg0[%c0_11, %c0_12, %c1_13] : memref<2x1x2xf32, #tpu.memory_space<vmem>>, vector<2x1x1xf32>
    %8 = vector.broadcast %0 : f32 to vector<2x1x1xf32>
    %9 = arith.mulf %6, %8 : vector<2x1x1xf32>
    %10 = vector.broadcast %1 : f32 to vector<2x1x1xf32>
    %11 = arith.mulf %7, %10 : vector<2x1x1xf32>
    %12 = arith.addf %9, %11 : vector<2x1x1xf32>
    %13 = vector.broadcast %4 : f32 to vector<2x1x1xf32>
    %14 = arith.addf %12, %13 : vector<2x1x1xf32>
    %15 = vector.broadcast %2 : f32 to vector<2x1x1xf32>
    %16 = arith.mulf %6, %15 : vector<2x1x1xf32>
    %17 = vector.broadcast %3 : f32 to vector<2x1x1xf32>
    %18 = arith.mulf %7, %17 : vector<2x1x1xf32>
    %19 = arith.addf %16, %18 : vector<2x1x1xf32>
    %20 = vector.broadcast %5 : f32 to vector<2x1x1xf32>
    %21 = arith.addf %19, %20 : vector<2x1x1xf32>
    %c0_14 = arith.constant 0 : index
    %c0_15 = arith.constant 0 : index
    %c0_16 = arith.constant 0 : index
    %22 = vector.load %arg4[%c0_14, %c0_15, %c0_16] : memref<2x1x2xf32, #tpu.memory_space<vmem>>, vector<2x1x1xf32>
    tpu.vector_store %arg4[%c0_14, %c0_15, %c0_16], %14 {strides = array<i32>} : memref<2x1x2xf32, #tpu.memory_space<vmem>>, vector<2x1x1xf32>,
    %c0_17 = arith.constant 0 : index
    %c0_18 = arith.constant 0 : index
    %c1_19 = arith.constant 1 : index
    %23 = vector.load %arg4[%c0_17, %c0_18, %c1_19] : memref<2x1x2xf32, #tpu.memory_space<vmem>>, vector<2x1x1xf32>
    tpu.vector_store %arg4[%c0_17, %c0_18, %c1_19], %21 {strides = array<i32>} : memref<2x1x2xf32, #tpu.memory_space<vmem>>, vector<2x1x1xf32>,
    %c0_20 = arith.constant 0 : index
    %c0_21 = arith.constant 0 : index
    %c0_22 = arith.constant 0 : index
    %24 = vector.load %arg5[%c0_20, %c0_21, %c0_22] : memref<2x2x1xf32, #tpu.memory_space<vmem>>, vector<2x1x1xf32>
    tpu.vector_store %arg5[%c0_20, %c0_21, %c0_22], %14 {strides = array<i32>} : memref<2x2x1xf32, #tpu.memory_space<vmem>>, vector<2x1x1xf32>,
    %c0_23 = arith.constant 0 : index
    %c1_24 = arith.constant 1 : index
    %c0_25 = arith.constant 0 : index
    %25 = vector.load %arg5[%c0_23, %c1_24, %c0_25] : memref<2x2x1xf32, #tpu.memory_space<vmem>>, vector<2x1x1xf32>
    tpu.vector_store %arg5[%c0_23, %c1_24, %c0_25], %21 {strides = array<i32>} : memref<2x2x1xf32, #tpu.memory_space<vmem>>, vector<2x1x1xf32>,
    %c0_26 = arith.constant 0 : index
    %c0_27 = arith.constant 0 : index
    %26 = vector.load %arg1[%c0_26, %c0_27] : memref<2x2xf32, #tpu.memory_space<vmem>>, vector<2x1xf32>
    %c0_28 = arith.constant 0 : index
    %c1_29 = arith.constant 1 : index
    %27 = vector.load %arg1[%c0_28, %c1_29] : memref<2x2xf32, #tpu.memory_space<vmem>>, vector<2x1xf32>
    %28 = vector.broadcast %0 : f32 to vector<2x1xf32>
    %29 = arith.mulf %26, %28 : vector<2x1xf32>
    %30 = vector.broadcast %1 : f32 to vector<2x1xf32>
    %31 = arith.mulf %27, %30 : vector<2x1xf32>
    %32 = arith.addf %29, %31 : vector<2x1xf32>
    %33 = vector.broadcast %4 : f32 to vector<2x1xf32>
    %34 = arith.addf %32, %33 : vector<2x1xf32>
    %c0_30 = arith.constant 0 : index
    %c0_31 = arith.constant 0 : index
    %35 = vector.load %arg6[%c0_30, %c0_31] : memref<2x2xf32, #tpu.memory_space<vmem>>, vector<2x1xf32>
    tpu.vector_store %arg6[%c0_30, %c0_31], %34 {strides = array<i32>} : memref<2x2xf32, #tpu.memory_space<vmem>>, vector<2x1xf32>,
    %36 = vector.broadcast %2 : f32 to vector<2x1xf32>
    %37 = arith.mulf %26, %36 : vector<2x1xf32>
    %38 = vector.broadcast %3 : f32 to vector<2x1xf32>
    %39 = arith.mulf %27, %38 : vector<2x1xf32>
    %40 = arith.addf %37, %39 : vector<2x1xf32>
    %41 = vector.broadcast %5 : f32 to vector<2x1xf32>
    %42 = arith.addf %40, %41 : vector<2x1xf32>
    %c0_32 = arith.constant 0 : index
    %c1_33 = arith.constant 1 : index
    %43 = vector.load %arg6[%c0_32, %c1_33] : memref<2x2xf32, #tpu.memory_space<vmem>>, vector<2x1xf32>
    tpu.vector_store %arg6[%c0_32, %c1_33], %42 {strides = array<i32>} : memref<2x2xf32, #tpu.memory_space<vmem>>, vector<2x1xf32>,
    return
  }
}

</mosaic_0001>

<bundles_post_ra>
// kernel: model_forward.1
= control target key start
LH: loop header
LB: loop body
LE: loop exit
PB: predicated region body
PF: predicated region fallthrough
CT: control target
= control target key end

     0   :  { %12 = vsyncpa [#allocation4], 0  ;;  %s348_s0 = inlined_call_operand.vmem [shape: f32[2,1,2], index: 0, kind: input, shape index: {}]   ;;  %s349_s1 = inlined_call_operand.vmem [shape: f32[2,2], index: 1, kind: input, shape index: {}]   ;;  %s350_s2 = inlined_call_operand.vmem [shape: f32[2,2], index: 2, kind: input, shape index: {}]   ;;  %s351_s3 = inlined_call_operand.vmem [shape: f32[2], index: 3, kind: input, shape index: {}]   ;;  %s352_s4 = inlined_call_operand.hbm [shape: f32[2,1,2], index: 4, kind: output, shape index: {0}]   ;;  %s353_s5 = inlined_call_operand.vmem [shape: f32[2,2,1], index: 5, kind: output, shape index: {1}]   ;;  %s354_s6 = inlined_call_operand.hbm [shape: f32[2,2], index: 6, kind: output, shape index: {2}]  }
   0x1   :  { %13 = vsyncpa [#allocation6], 0 }
   0x2   :  { %14 = vsyncpa [#allocation3], 0 }
   0x3   :  { %15 = vsyncpa [#allocation9], 0  ;;  %s26_s23 = sshll.u32 %s350_s2, 4  ;;  %s36_s26 = sshll.u32 %s351_s3, 4  ;;  %s27_s23 = int_to_ptr.vmem [resolvable:$true] %s26_s23  ;;  %s37_s26 = int_to_ptr.vmem [resolvable:$true] %s36_s26 }
   0x4   :  { %s191_s27 = scalar_lea.vmem %s27_s23, 32  ;;  %p196_p1 = scmp.lt.s32.totalorder %s27_s23, %s27_s23 }
   0x5   :  { %p192_p0 = scmp.ne.s32.totalorder %s27_s23, %s191_s27  ;;  %p197_p2 = scmp.lt.s32.totalorder %s191_s27, %s191_s27 }
   0x7   :  { %p198_p3 = por %p197_p2, %p196_p1 }
   0x9   :  { %p199_p4 = pnand %p198_p3, %p192_p0 }
   0xb   :  { %202 = shalt.err (!%p199_p4)
}
   0xc   :  { %s263_s28 = smov [#allocation2]   ;;  %s203_s29 = scalar_lea.vmem %s37_s26, 16 }
   0xd   :  { %29 = dma.vmem_to_smem %s27_s23, 32, %s263_s28, [#allocation4]  }
   0xe   :  { %p204_p5 = scmp.ne.s32.totalorder %s37_s26, %s203_s29  ;;  %p208_p6 = scmp.lt.s32.totalorder %s37_s26, %s37_s26 }
   0xf   :  { %p209_p7 = scmp.lt.s32.totalorder %s203_s29, %s203_s29 }
  0x11   :  { %p210_p8 = por %p209_p7, %p208_p6 }
  0x13   :  { %p211_p9 = pnand %p210_p8, %p204_p5 }
  0x15   :  { %214 = shalt.err (!%p211_p9)
}
  0x16   :  { %s264_s2 = smov [#allocation5]  }
  0x17   :  { %39 = dma.vmem_to_smem %s37_s26, 16, %s264_s2, [#allocation6]  }
  0x18   :  { %255 = dma.done.wait [#allocation4], 32  }
  0x19   :  { %256 = vsyncadd [#allocation4], 4294967264 }
  0x1a   :  { %257 = dma.done.wait [#allocation6], 16  }
  0x1b   :  { %258 = vsyncadd [#allocation6], 4294967280 }
  0x1c   :  { %46 = sfence }
  0x1d   :  { %s182_s3 = sld [smem:[#allocation2 + $0x81]]  ;;  %v53_v0 = vld [vmem:[%s348_s0] sm:$0x1]  ;;  %v54_v3 = vld [vmem:[%s348_s0 + $0x1] sm:$0x1]  ;;  %s265_s13 = smov 127   ;;  %v98_v11 = vlaneseq }
  0x1e   :  { %s180_s30 = sld [smem:[#allocation2 + $0x1]]  ;;  %v119_v1 = vld [vmem:[%s349_s1] sm:$0x3]  ;;  %vm93_vm0 = vcmask 0   ;;  %s266_s18 = smov 1   ;;  %vm128_vm1 = vcmask 1024  }
  0x1f   :  { %s181_s1 = sld [smem:[#allocation2 + $0x80]]  ;;  %v99_v14 = vshrl.u32 %v98_v11, 7  ;;  %vm112_vm2 = vcmask 8200   ;;  %s267_s25 = smov [#allocation7]   ;;  %vm142_vm3 = vcmask 9224  }
  0x20   :  { %s47_s14 = sld [smem:[#allocation2]]  ;;  %s149_s26 = sshll.u32 %s267_s25, 4  ;;  %s150_s26 = int_to_ptr.vmem [resolvable:$true] %s149_s26 }
  0x21   :  { %s183_s15 = sld [smem:[#allocation5 + $0x1]]  ;;  %v100_v22 = vsub.s32 0, %v99_v14  ;;  %s268_s27 = smov [#allocation8]  }
  0x22   :  { %s51_s0 = sld [smem:[#allocation5]]  ;;  %s164_s28 = sshll.u32 %s268_s27, 4  ;;  %s165_s28 = int_to_ptr.vmem [resolvable:$true] %s164_s28 }
  0x23   :  { %v77_v2 = vstv %s182_s3  ;;  %s215_s29 = scalar_lea.vmem %s150_s26, 32  ;;  %p220_p11 = scmp.lt.s32.totalorder %s150_s26, %s150_s26 }
  0x24   :  { %v78_v4 = vmul.f32 %v77_v2, %v53_v0  ;;  %v131_v5 = vmul.f32 %v119_v1, %v77_v2  ;;  %v79_v6 = vmul.f32 %v77_v2, %v54_v3  ;;  %v58_v7 = vstv %s180_s30  ;;  %p216_p10 = scmp.ne.s32.totalorder %s150_s26, %s215_s29  ;;  %p221_p12 = scmp.lt.s32.totalorder %s215_s29, %s215_s29 }
  0x25   :  { %v59_v8 = vmul.f32 %v58_v7, %v53_v0  ;;  %v60_v9 = vmul.f32 %v58_v7, %v54_v3  ;;  %v121_v10 = vmul.f32 %v119_v1, %v58_v7  ;;  %v74_v12 = vstv %s181_s1 }
  0x26   :  { %82 = vrot.lane.b32.xlu0 %v78_v4, %s265_s13  ;;  %133 = vrot.lane.b32.xlu1 %v131_v5, %s265_s13  ;;  %v75_v13 = vmul.f32 %v74_v12, %v53_v0  ;;  %v55_v15 = vstv %s47_s14  ;;  %v130_v16 = vmul.f32 %v119_v1, %v74_v12  ;;  %v76_v21 = vmul.f32 %v74_v12, %v54_v3  ;;  %p222_p13 = por %p221_p12, %p220_p11 }
  0x27   :  { %v90_v17 = vstv %s183_s15  ;;  %v56_v23 = vmul.f32 %v55_v15, %v53_v0  ;;  %v57_v29 = vmul.f32 %v55_v15, %v54_v3  ;;  %v120_v33 = vmul.f32 %v119_v1, %v55_v15 }
  0x28   :  { %v71_v27 = vstv %s51_s0  ;;  %p223_p0 = pnand %p222_p13, %p216_p10 }
  0x2a   :  { %84 = vrot.lane.b32.xlu0 %v79_v6, %s265_s13  ;;  %63 = vrot.lane.b32.xlu1 %v59_v8, %s265_s13 }
  0x2e   :  { %65 = vrot.lane.b32.xlu0 %v60_v9, %s265_s13  ;;  %123 = vrot.lane.b32.xlu1 %v121_v10, %s265_s13 }
  0x98   :  { %v83_v18 = vpop.permute.xlu0 %82  ;;  %v134_v19 = vpop.permute.xlu1 %133 }
  0x99   :  { %v88_v20 = vadd.f32 %v83_v18, %v75_v13  ;;  %v136_v25 = vadd.f32 %v134_v19, %v130_v16 }
  0x9b   :  { %v91_v24 = vadd.f32 %v90_v17, %v88_v20  ;;  %v137_v35 = vadd.f32 %v136_v25, %v90_v17 }
  0x9c   :  { %v85_v26 = vpop.permute.xlu0 %84  ;;  %v64_v28 = vpop.permute.xlu1 %63 }
  0x9d   :  { %117 = vst.msk [vmem:[%s353_s5 + $0x1] sm:$0x1] %vm93_vm0, %v91_v24  ;;  %v89_v30 = vadd.f32 %v85_v26, %v76_v21  ;;  %v101_v31 = vrot.slane %v91_v24, %v100_v22  ;;  %v69_v32 = vadd.f32 %v64_v28, %v56_v23 }
  0x9f   :  { %v92_v34 = vadd.f32 %v90_v17, %v89_v30  ;;  %106 = vrot.lane.b32.xlu0 %v101_v31, %s266_s18  ;;  %v72_v36 = vadd.f32 %v71_v27, %v69_v32 }
  0xa0   :  { %v66_v37 = vpop.permute.xlu0 %65  ;;  %v124_v38 = vpop.permute.xlu1 %123 }
  0xa1   :  { %118 = vst.msk [vmem:[%s353_s5 + $0x3] sm:$0x1] %vm93_vm0, %v92_v34  ;;  %v105_v39 = vrot.slane %v92_v34, %v100_v22  ;;  %115 = vst.msk [vmem:[%s353_s5] sm:$0x1] %vm93_vm0, %v72_v36  ;;  %v70_v40 = vadd.f32 %v66_v37, %v57_v29  ;;  %v126_v41 = vadd.f32 %v124_v38, %v120_v33 }
  0xa2   :  { %94 = vst.msk [vmem:[#allocation7] sm:$0x1] %vm93_vm0, %v72_v36 }
  0xa3   :  { %139 = vrot.lane.b32.xlu0 %v137_v35, %s266_s18  ;;  %108 = vrot.lane.b32.xlu1 %v105_v39, %s266_s18  ;;  %v73_v42 = vadd.f32 %v71_v27, %v70_v40  ;;  %v127_v43 = vadd.f32 %v126_v41, %v71_v27 }
  0xa5   :  { %116 = vst.msk [vmem:[%s353_s5 + $0x2] sm:$0x1] %vm93_vm0, %v73_v42  ;;  %95 = vst.msk [vmem:[#allocation7 + $0x1] sm:$0x1] %vm93_vm0, %v73_v42 }
  0xa6   :  { %129 = vst.msk [vmem:[#allocation8] sm:$0x3] %vm128_vm1, %v127_v43 }
 0x111   :  { %v107_v44 = vpop.permute.xlu0 %106 }
 0x112   :  { %113 = vst.msk [vmem:[#allocation7] sm:$0x1] %vm112_vm2, %v107_v44 }
 0x115   :  { %v140_v45 = vpop.permute.xlu0 %139  ;;  %v109_v46 = vpop.permute.xlu1 %108 }
 0x116   :  { %114 = vst.msk [vmem:[#allocation7 + $0x1] sm:$0x1] %vm112_vm2, %v109_v46 }
 0x117   :  { %143 = vst.msk [vmem:[#allocation8] sm:$0x3] %vm142_vm3, %v140_v45 }
 0x118   :  { %226 = shalt.err (!%p223_p0)
}
 0x119   :  { %s269_s5 = smov 16   ;;  %s235_s30 = scalar_lea.vmem %s165_s28, 32 }
 0x11a   :  { %155 = dma.vmem_to_hbm [thread:$0]  %s150_s26, 32, %s352_s4, [#allocation3], %s269_s5, %s269_s5, %s266_s18  }
 0x11b   :  { %p236_p1 = scmp.ne.s32.totalorder %s165_s28, %s235_s30  ;;  %p240_p2 = scmp.lt.s32.totalorder %s165_s28, %s165_s28 }
 0x11c   :  { %p241_p3 = scmp.lt.s32.totalorder %s235_s30, %s235_s30 }
 0x11e   :  { %p242_p4 = por %p241_p3, %p240_p2 }
 0x120   :  { %p243_p5 = pnand %p242_p4, %p236_p1 }
 0x122   :  { %246 = shalt.err (!%p243_p5)
}
 0x123   :  { %167 = dma.vmem_to_hbm [thread:$0]  %s165_s28, 32, %s354_s6, [#allocation9]  }
 0x124   :  { %259 = dma.done.wait [#allocation3], 32  }
 0x125   :  { %260 = vsyncadd [#allocation3], 4294967264 }
 0x126   :  { %261 = dma.done.wait [#allocation9], 32  }
 0x127   :  { %262 = vsyncadd [#allocation9], 4294967264 }
 0x128   :  { %176 = vsyncpa [#allocation3], 1 }
 0x129   :  { %177 = vsyncpa [#allocation9], 1 }
 0x12a   :  { %178 = vsyncpa [#allocation4], 1 }
 0x12b   :  { %179 = vsyncpa [#allocation6], 1 }

</bundles_post_ra>
